<compile_context>
chip_gen: v5e
topology: v5e:2x2
jax: 0.10.0
libtpu: 0.0.40
codegen_flags: <defaults>
</compile_context>

<pallas_src>
import functools

import jax
import jax.numpy as jnp
from jax.experimental import pallas as pl
from jax.experimental.pallas import tpu as pltpu


def _channel_attention_kernel(x_ref, w1t_ref, b1_ref, w2t_ref, b2_ref,
                              o_ref, acc_ref, *, inv_hw,
                              full_chunks, last_chunks, last_partial, nk):
    # x_ref:   (TB, C, TILE_HW)   streamed spatial tile of the input
    # w1t_ref: (C, Cr)            first 1x1 conv weight, pre-transposed, f32
    # b1_ref:  (1, Cr) f32
    # w2t_ref: (Cr, C)            second 1x1 conv weight, pre-transposed, f32
    # b2_ref:  (1, C) f32
    # o_ref:   (TB, 1, C)         channel-attention logits for this batch block
    # acc_ref: (TB, C, 128) f32   running per-channel partial sums (lane-split)
    k = pl.program_id(1)

    @pl.when(k == 0)
    def _init():
        acc_ref[...] = jnp.zeros_like(acc_ref)

    def _partial_sum(n_chunks, partial_lanes):
        # Sum n_chunks lane-aligned 128-wide chunks straight from the ref into
        # up to 4 independent f32 accumulators (breaks the serial VALU chain),
        # masking the trailing ragged chunk when partial_lanes > 0.
        n_acc = max(1, min(4, n_chunks))
        accs = [None] * n_acc
        for j in range(n_chunks):
            chunk = x_ref[:, :, j * 128:(j + 1) * 128].astype(jnp.float32)
            if partial_lanes and j == n_chunks - 1:
                lane = jax.lax.broadcasted_iota(jnp.int32, chunk.shape, 2)
                chunk = jnp.where(lane < partial_lanes, chunk, 0.0)
            slot = j % n_acc
            accs[slot] = chunk if accs[slot] is None else accs[slot] + chunk
        accs = [a for a in accs if a is not None]
        while len(accs) > 1:
            nxt = []
            for i in range(0, len(accs) - 1, 2):
                nxt.append(accs[i] + accs[i + 1])
            if len(accs) % 2:
                nxt.append(accs[-1])
            accs = nxt
        return accs[0]

    if nk > 1:
        @pl.when(k < nk - 1)
        def _stream_full():
            acc_ref[...] += _partial_sum(full_chunks, 0)

    # Last spatial tile of this batch block: masked accumulation + epilogue
    # (one cross-lane reduce, the mean, and the two tiny matmuls).
    @pl.when(k == nk - 1)
    def _last_and_epilogue():
        acc_ref[...] += _partial_sum(last_chunks, last_partial)
        gap = jnp.sum(acc_ref[...], axis=-1) * inv_hw                  # (TB, C) f32
        h = jnp.dot(gap, w1t_ref[...], preferred_element_type=jnp.float32)
        h = jnp.maximum(h + b1_ref[...], 0.0)                          # (TB, Cr)
        out = jnp.dot(h, w2t_ref[...], preferred_element_type=jnp.float32)
        out = out + b2_ref[...]                                        # (TB, C)
        o_ref[...] = out.reshape(o_ref.shape).astype(o_ref.dtype)


def channel_attention(x_nchw, w1, b1, w2, b2, *, tile_b=None):
    """ChannelAttention forward. x_nchw: (B, C, H, W) -> (B, C, 1, 1)."""
    B, C, H, W = x_nchw.shape
    Cr = w1.shape[0]
    HW = H * W
    itemsize = jnp.dtype(x_nchw.dtype).itemsize

    # Generation-aware VMEM budgets (128 MiB on v5e/v6e, 64 MiB on v7x).
    try:
        vmem_cap = int(pltpu.get_tpu_info().vmem_capacity_bytes)
    except Exception:
        vmem_cap = 64 << 20  # conservative (v7x-sized) fallback
    if vmem_cap >= (100 << 20):
        db_budget = 64 << 20        # double-buffered x-block budget
        vmem_clamp = 96 << 20
    else:
        db_budget = 24 << 20
        vmem_clamp = 48 << 20

    # Batch tile: amortize the epilogue over up to 8 batches, but keep >= 2
    # batch blocks whenever B >= 2 so the "parallel" axis can shard across
    # both v7x TensorCores (no-op on single-TC v5e/v6e).
    if tile_b is None:
        tile_b = min(8, B)
        if B >= 2:
            tile_b = min(tile_b, max(1, B // 2))
    tile_b = max(1, min(tile_b, B))
    while B % tile_b != 0:
        tile_b -= 1

    # Spatial tile: as many lane-aligned 128-wide chunks as the double-buffer
    # budget allows; when HW fits, the whole spatial extent goes in one block
    # (fully contiguous DMA, single k step per batch block).
    hw_chunks = pl.cdiv(HW, 128)
    budget_chunks = max(1, db_budget // (2 * tile_b * C * 128 * itemsize))
    full_chunks = max(1, min(hw_chunks, budget_chunks))
    tile = full_chunks * 128

    nk = pl.cdiv(HW, tile)
    last_extent = HW - (nk - 1) * tile
    last_chunks = pl.cdiv(last_extent, 128)
    last_partial = last_extent % 128          # 0 => last chunk is full

    # No spatial padding: the ragged tail is masked in-kernel.
    x = x_nchw.reshape(B, C, HW)

    # Pre-transpose + pre-cast weights once on the host side.
    w1t = jnp.transpose(w1).astype(jnp.float32)      # (C, Cr)
    w2t = jnp.transpose(w2).astype(jnp.float32)      # (Cr, C)
    b1_2d = b1.reshape(1, Cr).astype(jnp.float32)
    b2_2d = b2.reshape(1, C).astype(jnp.float32)

    grid = (B // tile_b, nk)

    # Explicit VMEM sizing: double-buffered x block + weights + scratch + out.
    x_block_bytes = 2 * tile_b * C * tile * itemsize
    w_bytes = 2 * 4 * (2 * C * Cr + C + Cr)
    acc_bytes = 4 * tile_b * C * 128
    out_bytes = 2 * tile_b * C * itemsize
    vmem_limit = x_block_bytes + w_bytes + acc_bytes + out_bytes + (4 << 20)
    vmem_limit = int(min(max(vmem_limit, 16 << 20), vmem_clamp))

    kernel = functools.partial(
        _channel_attention_kernel,
        inv_hw=1.0 / float(HW),
        full_chunks=int(full_chunks),
        last_chunks=int(last_chunks),
        last_partial=int(last_partial),
        nk=int(nk),
    )

    out = pl.pallas_call(
        kernel,
        out_shape=jax.ShapeDtypeStruct((B, 1, C), x_nchw.dtype),
        grid_spec=pltpu.PrefetchScalarGridSpec(
            num_scalar_prefetch=0,
            grid=grid,
            in_specs=[
                pl.BlockSpec((tile_b, C, tile), lambda b, k: (b, 0, k)),  # x tile
                pl.BlockSpec((C, Cr), lambda b, k: (0, 0)),               # w1t (resident)
                pl.BlockSpec((1, Cr), lambda b, k: (0, 0)),               # b1  (resident)
                pl.BlockSpec((Cr, C), lambda b, k: (0, 0)),               # w2t (resident)
                pl.BlockSpec((1, C), lambda b, k: (0, 0)),                # b2  (resident)
            ],
            out_specs=pl.BlockSpec((tile_b, 1, C), lambda b, k: (b, 0, 0)),
            scratch_shapes=[pltpu.VMEM((tile_b, C, 128), jnp.float32)],
        ),
        compiler_params=pltpu.CompilerParams(
            dimension_semantics=("parallel", "arbitrary"),
            vmem_limit_bytes=vmem_limit,
        ),
    )(x, w1t, b1_2d, w2t, b2_2d)

    return out.reshape(B, C, 1, 1)


if __name__ == "__main__":
    # Small shapes consistent with the module: dim=C, reduction=2.
    B, C, H, W = 2, 4, 16, 16
    reduction = 2
    Cr = C // reduction

    key = jax.random.PRNGKey(0)
    kx, kw1, kb1, kw2, kb2 = jax.random.split(key, 5)

    x = jax.random.normal(kx, (B, C, H, W), dtype=jnp.float32)

    # Conv2d 1x1 weights squeezed to (out, in), biases to (out,).
    w1 = jax.random.normal(kw1, (Cr, C), dtype=jnp.float32) * 0.1
    b1 = jax.random.normal(kb1, (Cr,), dtype=jnp.float32) * 0.1
    w2 = jax.random.normal(kw2, (C, Cr), dtype=jnp.float32) * 0.1
    b2 = jax.random.normal(kb2, (C,), dtype=jnp.float32) * 0.1

    out = channel_attention(x, w1, b1, w2, b2)
    out = jax.block_until_ready(out)

    # Reference in plain JAX (same math as the PyTorch module).
    gap_ref = jnp.mean(x, axis=(2, 3))                       # (B, C)
    h_ref = jnp.maximum(gap_ref @ w1.T + b1, 0.0)            # (B, Cr)
    ref = (h_ref @ w2.T + b2).reshape(B, C, 1, 1)            # (B, C, 1, 1)
    assert out.shape == (B, C, 1, 1)
    assert jnp.allclose(out, ref, atol=1e-5, rtol=1e-5)

    # Extra check: ragged spatial extent (HW not a multiple of 128) exercises
    # the in-kernel masking path that replaced the wrapper-side jnp.pad.
    H2, W2 = 10, 9
    x2 = jax.random.normal(kx, (B, C, H2, W2), dtype=jnp.float32)
    out2 = jax.block_until_ready(channel_attention(x2, w1, b1, w2, b2))
    gap2 = jnp.mean(x2, axis=(2, 3))
    ref2 = (jnp.maximum(gap2 @ w1.T + b1, 0.0) @ w2.T + b2).reshape(B, C, 1, 1)
    assert jnp.allclose(out2, ref2, atol=1e-5, rtol=1e-5)

    print("KERNEL_OK")
</pallas_src>

<mosaic_0001>
module attributes {stable_mosaic.version = 11 : i64} {
  func.func @_channel_attention_kernel(%arg0: i32, %arg1: i32, %arg2: memref<1x4x256xf32, #tpu.memory_space<vmem>>, %arg3: memref<4x2xf32, #tpu.memory_space<vmem>>, %arg4: memref<1x2xf32, #tpu.memory_space<vmem>>, %arg5: memref<2x4xf32, #tpu.memory_space<vmem>>, %arg6: memref<1x4xf32, #tpu.memory_space<vmem>>, %arg7: memref<1x1x4xf32, #tpu.memory_space<vmem>>, %arg8: memref<1x4x128xf32, #tpu.memory_space<vmem>>) attributes {dimension_semantics = [#tpu.dimension_semantics<parallel>, #tpu.dimension_semantics<arbitrary>], iteration_bounds = array<i64: 2, 1>, scalar_prefetch = 0 : i64, scratch_operands = 1 : i64, tpu.core_type = #tpu.core_type<tc>, window_params = [{transform_indices = @transform_0, window_bounds = array<i64: 1, 4, 256>}, {pipeline_mode = #tpu.pipeline_mode<synchronous>, transform_indices = @transform_1, window_bounds = array<i64: 4, 2>}, {pipeline_mode = #tpu.pipeline_mode<synchronous>, transform_indices = @transform_2, window_bounds = array<i64: 1, 2>}, {pipeline_mode = #tpu.pipeline_mode<synchronous>, transform_indices = @transform_3, window_bounds = array<i64: 2, 4>}, {pipeline_mode = #tpu.pipeline_mode<synchronous>, transform_indices = @transform_4, window_bounds = array<i64: 1, 4>}, {transform_indices = @transform_5, window_bounds = array<i64: 1, 1, 4>}]} {
    %c0_i32 = arith.constant 0 : i32
    %0 = arith.cmpi eq, %arg1, %c0_i32 : i32
    %1 = arith.extui %0 : i1 to i32
    %c0_i32_0 = arith.constant 0 : i32
    %2 = arith.cmpi ne, %1, %c0_i32_0 : i32
    scf.if %2 {
      %cst = arith.constant 0.000000e+00 : f32
      %6 = vector.broadcast %cst : f32 to vector<1x4x128xf32>
      %c0 = arith.constant 0 : index
      %c0_3 = arith.constant 0 : index
      %c0_4 = arith.constant 0 : index
      %7 = vector.load %arg8[%c0, %c0_3, %c0_4] : memref<1x4x128xf32, #tpu.memory_space<vmem>>, vector<1x4x128xf32>
      tpu.vector_store %arg8[%c0, %c0_3, %c0_4], %6 {strides = array<i32>} : memref<1x4x128xf32, #tpu.memory_space<vmem>>, vector<1x4x128xf32>,
    } else {
    }
    %c0_i32_1 = arith.constant 0 : i32
    %3 = arith.cmpi eq, %arg1, %c0_i32_1 : i32
    %4 = arith.extui %3 : i1 to i32
    %c0_i32_2 = arith.constant 0 : i32
    %5 = arith.cmpi ne, %4, %c0_i32_2 : i32
    scf.if %5 {
      %c0 = arith.constant 0 : index
      %c0_3 = arith.constant 0 : index
      %c0_4 = arith.constant 0 : index
      %6 = vector.load %arg8[%c0, %c0_3, %c0_4] : memref<1x4x128xf32, #tpu.memory_space<vmem>>, vector<1x4x128xf32>
      %c0_5 = arith.constant 0 : index
      %c0_6 = arith.constant 0 : index
      %c0_7 = arith.constant 0 : index
      %7 = vector.load %arg2[%c0_5, %c0_6, %c0_7] : memref<1x4x256xf32, #tpu.memory_space<vmem>>, vector<1x4x128xf32>
      %c0_8 = arith.constant 0 : index
      %c0_9 = arith.constant 0 : index
      %c128 = arith.constant 128 : index
      %8 = vector.load %arg2[%c0_8, %c0_9, %c128] : memref<1x4x256xf32, #tpu.memory_space<vmem>>, vector<1x4x128xf32>
      %9 = arith.addf %7, %8 : vector<1x4x128xf32>
      %10 = arith.addf %6, %9 : vector<1x4x128xf32>
      %c0_10 = arith.constant 0 : index
      %c0_11 = arith.constant 0 : index
      %c0_12 = arith.constant 0 : index
      %11 = vector.load %arg8[%c0_10, %c0_11, %c0_12] : memref<1x4x128xf32, #tpu.memory_space<vmem>>, vector<1x4x128xf32>
      tpu.vector_store %arg8[%c0_10, %c0_11, %c0_12], %10 {strides = array<i32>} : memref<1x4x128xf32, #tpu.memory_space<vmem>>, vector<1x4x128xf32>,
      %c0_13 = arith.constant 0 : index
      %c0_14 = arith.constant 0 : index
      %c0_15 = arith.constant 0 : index
      %12 = vector.load %arg8[%c0_13, %c0_14, %c0_15] : memref<1x4x128xf32, #tpu.memory_space<vmem>>, vector<1x4x128xf32>
      %cst = arith.constant dense<0.000000e+00> : vector<1x4xf32>
      %13 = vector.multi_reduction <add>, %12, %cst [2] : vector<1x4x128xf32> to vector<1x4xf32>
      %cst_16 = arith.constant 3.906250e-03 : f32
      %14 = vector.broadcast %cst_16 : f32 to vector<1x4xf32>
      %15 = arith.mulf %13, %14 : vector<1x4xf32>
      %c0_17 = arith.constant 0 : index
      %c0_18 = arith.constant 0 : index
      %16 = vector.load %arg3[%c0_17, %c0_18] : memref<4x2xf32, #tpu.memory_space<vmem>>, vector<4x2xf32>
      %cst_19 = arith.constant dense<0.000000e+00> : vector<1x2xf32>
      %17 = tpu.matmul %15, %16, %cst_19 {dimension_numbers = #tpu.dot_dimension_numbers<[1], [0], [0], [1], [0, 0, 1, 1], [], []>} : vector<1x4xf32>, vector<4x2xf32>, vector<1x2xf32> -> vector<1x2xf32>
      %c0_20 = arith.constant 0 : index
      %c0_21 = arith.constant 0 : index
      %18 = vector.load %arg4[%c0_20, %c0_21] : memref<1x2xf32, #tpu.memory_space<vmem>>, vector<1x2xf32>
      %19 = arith.addf %17, %18 : vector<1x2xf32>
      %cst_22 = arith.constant 0.000000e+00 : f32
      %20 = vector.broadcast %cst_22 : f32 to vector<1x2xf32>
      %21 = arith.maximumf %19, %20 : vector<1x2xf32>
      %c0_23 = arith.constant 0 : index
      %c0_24 = arith.constant 0 : index
      %22 = vector.load %arg5[%c0_23, %c0_24] : memref<2x4xf32, #tpu.memory_space<vmem>>, vector<2x4xf32>
      %cst_25 = arith.constant dense<0.000000e+00> : vector<1x4xf32>
      %23 = tpu.matmul %21, %22, %cst_25 {dimension_numbers = #tpu.dot_dimension_numbers<[1], [0], [0], [1], [0, 0, 1, 1], [], []>} : vector<1x2xf32>, vector<2x4xf32>, vector<1x4xf32> -> vector<1x4xf32>
      %c0_26 = arith.constant 0 : index
      %c0_27 = arith.constant 0 : index
      %24 = vector.load %arg6[%c0_26, %c0_27] : memref<1x4xf32, #tpu.memory_space<vmem>>, vector<1x4xf32>
      %25 = arith.addf %23, %24 : vector<1x4xf32>
      %26 = vector.shape_cast %25 : vector<1x4xf32> to vector<1x1x4xf32>
      %c0_28 = arith.constant 0 : index
      %c0_29 = arith.constant 0 : index
      %c0_30 = arith.constant 0 : index
      %27 = vector.load %arg7[%c0_28, %c0_29, %c0_30] : memref<1x1x4xf32, #tpu.memory_space<vmem>>, vector<1x1x4xf32>
      tpu.vector_store %arg7[%c0_28, %c0_29, %c0_30], %26 {strides = array<i32>} : memref<1x1x4xf32, #tpu.memory_space<vmem>>, vector<1x1x4xf32>,
    } else {
    }
    return
  }
  func.func @transform_0(%arg0: i32, %arg1: i32) -> (i32, i32, i32) {
    %c0_i32 = arith.constant 0 : i32
    %c0_i32_0 = arith.constant 0 : i32
    return %arg0, %c0_i32, %arg1 : i32, i32, i32
  }
  func.func @transform_1(%arg0: i32, %arg1: i32) -> (i32, i32) {
    %c0_i32 = arith.constant 0 : i32
    %c0_i32_0 = arith.constant 0 : i32
    %c0_i32_1 = arith.constant 0 : i32
    return %c0_i32, %c0_i32_0 : i32, i32
  }
  func.func @transform_2(%arg0: i32, %arg1: i32) -> (i32, i32) {
    %c0_i32 = arith.constant 0 : i32
    %c0_i32_0 = arith.constant 0 : i32
    %c0_i32_1 = arith.constant 0 : i32
    return %c0_i32, %c0_i32_0 : i32, i32
  }
  func.func @transform_3(%arg0: i32, %arg1: i32) -> (i32, i32) {
    %c0_i32 = arith.constant 0 : i32
    %c0_i32_0 = arith.constant 0 : i32
    %c0_i32_1 = arith.constant 0 : i32
    return %c0_i32, %c0_i32_0 : i32, i32
  }
  func.func @transform_4(%arg0: i32, %arg1: i32) -> (i32, i32) {
    %c0_i32 = arith.constant 0 : i32
    %c0_i32_0 = arith.constant 0 : i32
    %c0_i32_1 = arith.constant 0 : i32
    return %c0_i32, %c0_i32_0 : i32, i32
  }
  func.func @transform_5(%arg0: i32, %arg1: i32) -> (i32, i32, i32) {
    %c0_i32 = arith.constant 0 : i32
    %c0_i32_0 = arith.constant 0 : i32
    %c0_i32_1 = arith.constant 0 : i32
    return %arg0, %c0_i32, %c0_i32_0 : i32, i32, i32
  }
}

</mosaic_0001>

<bundles_post_ra>
// kernel: tpu_custom_call.1
= control target key start
LH: loop header
LB: loop body
LE: loop exit
PB: predicated region body
PF: predicated region fallthrough
CT: control target
= control target key end

     0   :  { %10 = vsyncpa [#allocation4], 0  ;;  %s788_s0 = inlined_call_operand.hbm [shape: f32[2,4,256], index: 0, kind: input, shape index: {}]   ;;  %s789_s1 = inlined_call_operand.vmem [shape: f32[4,2], index: 1, kind: input, shape index: {}]   ;;  %s790_s2 = inlined_call_operand.vmem [shape: f32[1,2], index: 2, kind: input, shape index: {}]   ;;  %s791_s3 = inlined_call_operand.vmem [shape: f32[2,4], index: 3, kind: input, shape index: {}]   ;;  %s792_s4 = inlined_call_operand.vmem [shape: f32[1,4], index: 4, kind: input, shape index: {}]   ;;  %s793_s5 = inlined_call_operand.hbm [shape: f32[2,1,4], index: 5, kind: output, shape index: {}]  }
   0x1   :  { %12 = vsyncpa [#allocation4 + $0x1], 0 }
   0x2   :  { %13 = vsyncpa [#allocation5], 0 }
   0x3   :  { %15 = vsyncpa [#allocation5 + $0x1], 0  ;;  %s655_s18 = smov 0   ;;  %s657_s19 = smov 0  }
   0x4   :  { %s659_s20 = smov 0   ;;  %s661_s21 = smov 0  }
   0x5   :  { %s663_s22 = smov 0   ;;  %s665_s23 = smov 0  }
   0x6 LB: > { %s431_s24 = sadd.s32 4294967295, %s622_s23   ;;  %s432_s25 = sadd.s32 4294967294, %s622_s23   ;;  %s622_s23 = sphi %s665_s23, %s21_s23   ;;  %s618_s22 = sphi %s663_s22, %s802_s22   ;;  %s614_s21 = sphi %s661_s21, %s801_s21   ;;  %s610_s20 = sphi %s659_s20, %s800_s20   ;;  %s606_s19 = sphi %s657_s19, %s799_s19   ;;  %s602_s18 = sphi %s655_s18, %s798_s18  }
   0x7   : > { %s33_s26 = sadd.s32 1, %s618_s22  ;;  %s42_s27 = sadd.s32 1, %s610_s20 }
   0x8   : > { %p35_p0 = scmp.ge.s32.totalorder %s33_s26, 2  ;;  %p49_p1 = scmp.ne.s32.totalorder %s610_s20, %s606_s19 }
   0x9   : > { %p50_p2 = scmp.eq.s32.totalorder %s622_s23, 0  ;;  %p55_p3 = scmp.ne.s32.totalorder %s606_s19, %s602_s18 }
   0xa   : > { %s804_s26 = smov (%p35_p0, %s33_s26), 0  ;;  %p56_p5 = scmp.eq.s32.totalorder %s431_s24, 0 }
   0xb   : > { %p696_p4 = por %p50_p2, %p49_p1  ;;  %s37_s29 = ssub.s32 %s618_s22, %s804_s26 }
   0xc   : > { %p163_p6 = scmp.eq.s32.totalorder %s431_s24, 1  ;;  %p40_p7 = scmp.eq.s32.totalorder %s37_s29, 0 }
   0xd   : > { %p702_p8 = por %p56_p5, %p55_p3  ;;  %p169_p10 = scmp.eq.s32.totalorder %s432_s25, 1 }
   0xe   : > { %p706_p9 = por %p163_p6, %p49_p1  ;;  %p434_p12 = scmp.ge.s32.totalorder %s622_s23, 2 }
   0xf   : > { %s711_s7 = scalar_select %p40_p7, %s610_s20, %s42_s27  }
  0x10   : > { %p713_p11 = por %p169_p10, %p55_p3  ;;  %p459_p13 = scmp.lt.s32.totalorder %s622_s23, 2 }
  0x11   : > { %s201_s9 = sand.u32 1, %s610_s20   ;;  %s446_s11 = sshll.u32 %s618_s22, 3 }
  0x12   : > { %s435_s10 = sshll.u32 %s201_s9, 3  ;;  %s212_s14 = scalar_lea.hbm %s788_s0, %s446_s11 }
  0x13   : > { %s205_s15 = scalar_lea.vmem [#allocation3], %s435_s10  ;;  %s214_s17 = sshll.u32 %s212_s14, 4  ;;  %s215_s17 = int_to_ptr.hbm [resolvable:$true] %s214_s17 }
  0x14   : > { %s216_s16 = sshll.u32 %s205_s15, 4  ;;  %p452_p0 = pnand %p459_p13, %p696_p4  ;;  %s217_s16 = int_to_ptr.vmem [resolvable:$true] %s216_s16 }
  0x15   : > { %p438_p1 = scmp.ge.s32.totalorder %s622_s23, 1  ;;  %p221_p2 = scmp.lt.s32.totalorder %s622_s23, 3 }
  0x16   : > { %s202_s24 = scalar_lea.sflag [#allocation4], %s201_s9 }
  0x17   : > { %454 = dma.hbm_to_vmem [thread:$0]  (!%p452_p0), %s215_s17, 128, %s217_s16, %s202_s24  }
  0x18   : > { %p222_p3 = pnand %p438_p1, %p221_p2 }
  0x19   : > { %s729_s25 = sand.u32 (!%p222_p3), 1, %s606_s19  }
  0x1a   : > { %225 = sbr.rel (%p222_p3) target bundleno = 433 (0x1b1), region = 40  ;;  %s439_s27 = sshll.u32 (!%p222_p3), %s729_s25, 3 }
  0x1b   : > { %s228_s29 = scalar_lea.sflag (!%p222_p3), [#allocation4], %s729_s25  ;;  %s231_s10 = scalar_lea.vmem (!%p222_p3), [#allocation3], %s439_s27 }
  0x1f   : > { %593 = dma.done.wait (%p702_p8), %s228_s29, 128  }
  0x20   : > { %595 = vsyncadd (%p702_p8), %s228_s29, 4294967168  ;;  %v624_v0 = vmov 0.0   ;;  %v265_v1 = vld [vmem:[%s231_s10] sm:$0xf]  ;;  %v266_v2 = vld [vmem:[%s231_s10 + $0x4] sm:$0xf]  ;;  %v279_v9 = vlaneseq  ;;  %s350_s16 = scalar_lea.hbm %s793_s5, %s614_s21 }
  0x21   : > { %263 = vst [vmem:[#allocation2] sm:$0xf] %v624_v0  ;;  %v267_v4 = vadd.f32 %v266_v2, %v265_v1  ;;  %vm271_vm0 = vcmask 1043456   ;;  %v276_v8 = vld [vmem:[%s789_s1] sm:$0xf]  ;;  %vm282_vm1 = vcmask 31744  }
  0x22   : > { %440 = vmatpush.msk.msra.mxu0 %vm271_vm0, %v276_v8  ;;  %v280_v10 = vand.u32 127, %v279_v9  ;;  %v309_v14 = vld [vmem:[%s791_s3] sm:$0x3]  ;;  %vm315_vm2 = vcmask 1041408   ;;  %vm311_vm3 = vcmask 15360   ;;  %s257_s27 = scalar_lea.vmem [#allocation6], %s729_s25 }
  0x23   : > { %442 = vmatpush.msk.msra.mxu1 %vm315_vm2, %v309_v14  ;;  %v277_v15 = vld [vmem:[%s790_s2] sm:$0x1]  ;;  %s352_s29 = sshll.u32 %s257_s27, 4  ;;  %s354_s10 = sshll.u32 %s350_s16, 4  ;;  %vm339_vm4 = vcmask 24576   ;;  %s353_s29 = int_to_ptr.vmem [resolvable:$true] %s352_s29  ;;  %s355_s10 = int_to_ptr.hbm [resolvable:$true] %s354_s10 }
  0x24   : > { %v310_v19 = vld [vmem:[%s792_s4] sm:$0x1]  ;;  %s342_s28 = scalar_lea.sflag [#allocation5], %s729_s25  ;;  %s554_s9 = sshra.s32 %s355_s10, 4  ;;  %s555_s9 = int_to_ptr.hbm [resolvable:$true] %s554_s9 }
  0x25   : > { %s556_s30 = scalar_lea.hbm %s555_s9, 1  ;;  %s560_s12 = scalar_lea.hbm %s793_s5, 2 }
  0x26   : > { %p557_p4 = scmp.ne.s32.totalorder %s555_s9, %s556_s30  ;;  %p561_p7 = scmp.lt.s32.totalorder %s555_s9, %s793_s5 }
  0x27   : > { %p562_p8 = scmp.lt.s32.totalorder %s560_s12, %s556_s30 }
  0x28   : > { %v264_v3 = vld [vmem:[#allocation2] sm:$0xf]  ;;  %p558_p5 = pnand %p557_p4, %p706_p9 }
  0x29   : > { %v268_v5 = vadd.f32 %v267_v4, %v264_v3  ;;  %p563_p10 = por %p562_p8, %p561_p7 }
  0x2a   : > { %p559_p6 = pneg %p558_p5 }
  0x2b   : > { %269 = vst [vmem:[#allocation2] sm:$0xf] %v268_v5 }
  0x2c   : > { %p564_p13 = pnand %p563_p10, %p559_p6 }
  0x32   : > { %v270_v6 = vld [vmem:[#allocation2] sm:$0xf] }
  0x33   : > { %v272_v7 = vsel %vm271_vm0, %v270_v6, 0.0 }
  0x34   : > { %273 = vadd.xlane.f32.xlu0 %v272_v7 }
  0xa7   : > { %v274_v11 = vpop.xlane.xlu0 %273 }
  0xa8   : > { %v275_v12 = vmul.f32 0.00390625, %v274_v11 }
  0xaa   : > { %v281_v13 = vperm.slane %v275_v12, %v280_v10 }
  0xac   : > { %441 = vmatmul.msk.f32.vlgmr.msra.gmra.mxu0 %vm282_vm1, %v281_v13 }
 0x129   : > { %v305_v16 = vpop.f32.mrf.mxu0 }
 0x12a   : > { %v306_v17 = vadd.f32 %v305_v16, %v277_v15 }
 0x12c   : > { %v308_v18 = vmax.f32 %v306_v17, 0.0 }
 0x12e   : > { %443 = vmatmul.msk.f32.vlgmr.msra.gmra.mxu1 %vm311_vm3, %v308_v18 }
 0x1ab   : > { %v336_v20 = vpop.f32.mrf.mxu1 }
 0x1ac   : > { %v337_v21 = vadd.f32 %v336_v20, %v310_v19 }
 0x1ae   : > { %340 = vst.msk [vmem:[%s257_s27] sm:$0x1] %vm339_vm4, %v337_v21 }
 0x1af   : > { %567 = shalt.err (!%p564_p13)
}
 0x1b0   : > { %449 = dma.vmem_to_hbm [thread:$0]  (%p706_p9), %s353_s29, 16, %s355_s10, %s342_s28  }
 0x1b1 PF: > { %s366_s25 = sand.u32 1, %s602_s18   ;;  %p456_p0 = pnand %p434_p12, %p713_p11 }
 0x1b2   : > { %s367_s15 = scalar_lea.sflag [#allocation5], %s366_s25 }
 0x1b3   : > { %p457_p1 = pneg %p456_p0 }
 0x1b5   : > { %597 = dma.done.wait (%p457_p1), %s367_s15, 16  }
 0x1b6   : > { %599 = vsyncadd (%p457_p1), %s367_s15, 4294967280  ;;  %s21_s23 = sadd.s32 1, %s622_s23   ;;  %s798_s18 = smov %s606_s19 }
 0x1b7   : > { %p18_p2 = scmp.ge.s32.totalorder %s21_s23, 4   ;;  %s799_s19 = smov %s610_s20 }
 0x1b8   : > { %s800_s20 = smov %s711_s7  ;;  %s801_s21 = smov %s618_s22 }
 0x1b9   : > { %s802_s22 = smov %s804_s26  ;;  %20 = sbr.rel (!%p18_p2) target bundleno = 6 (0x6), region = 89 }
 0x1be   :  { %372 = vsyncpa [#allocation4], 1 }
 0x1bf   :  { %374 = vsyncpa [#allocation4 + $0x1], 1 }
 0x1c0   :  { %375 = vsyncpa [#allocation5], 1 }
 0x1c1   :  { %377 = vsyncpa [#allocation5 + $0x1], 1 }

</bundles_post_ra>
